<compile_context>
chip_gen: v7x
topology: tpu7x:2x2x1
jax: 0.10.0
libtpu: 0.0.40
codegen_flags: <defaults>
</compile_context>

<pallas_src>
import math

import jax
import jax.numpy as jnp
import numpy as np
from jax.experimental import pallas as pl
from jax.experimental.pallas import tpu as pltpu


def _fused_affine_kernel(x_ref, m_ref, a_ref, y_ref):
    """One grid step == one spatial tile, whole chain already composed.

    m_ref / a_ref are (rows, 1); the lane broadcast is a vreg splat that fuses
    into the multiply-add (no materialized VMEM temp).
    """
    m = m_ref[...]
    a = a_ref[...]
    y_ref[...] = (x_ref[...].astype(m.dtype) * m + a).astype(y_ref.dtype)


def _vmem_capacity_bytes():
    """Physical VMEM of the current chip (falls back to 128 MiB = v5e/v6e)."""
    try:
        info = pltpu.get_tpu_info()
        cap = getattr(info, "vmem_capacity_bytes", None)
        if cap:
            return int(cap)
    except Exception:
        pass
    return 128 << 20


def _choose_tile_hw(hw, rows, itemsize, vmem_capacity):
    """Largest lane-dense (multiple-of-128) tile that (a) stays inside a
    generation-aware per-block VMEM budget and (b) leaves >= 2 grid tiles so
    the pipeline overlaps DMA/compute and v7x can shard its 2 TensorCores."""
    if hw <= 128:
        return hw  # full-extent lane dim (allowed: block dim == array dim)
    small_vmem = vmem_capacity <= (64 << 20)            # v7x: 64 MiB per TC
    budget = (3 << 20) if small_vmem else (16 << 20)    # per-block bytes
    max_lanes = max(128, (budget // max(1, rows * itemsize)) // 128 * 128)
    if hw > 256:  # keep at least 2 tiles (pipelining / 2-TC sharding)
        half = ((hw + 1) // 2 + 127) // 128 * 128
        max_lanes = min(max_lanes, max(128, half))
    tile = min(max_lanes, (hw + 127) // 128 * 128)
    return max(128, (tile // 128) * 128)


def sequential_flow(x, logpx=None, scales=None, biases=None, reg_states=tuple(),
                    reverse=False, inds=None, concat_var=None, tile_hw=None,
                    donate_x=False):
    """Pallas implementation of SequentialFlow.forward.

    x       : (N, C, H, W) float32/bfloat16 (NCHW, like PyTorch)
    logpx   : (N, 1) float32 or None (passed through as None, like the container)
    scales  : (L, C) float32  -- per-layer, per-channel log-scales
    biases  : (L, C) float32  -- per-layer, per-channel biases
    Returns (x_out, logpx_out, reg_states).
    """
    del concat_var  # TODO(synk): only consumed by CNF (neural-ODE) chain members.
    N, C, H, W = x.shape
    HW = H * W
    L = scales.shape[0]

    if inds is None:
        inds = list(range(L - 1, -1, -1)) if reverse else list(range(L))
    else:
        inds = list(inds)
    n_steps = len(inds)

    logpx_in = None if logpx is None else logpx.astype(jnp.float32)
    if n_steps == 0:
        return x, logpx_in, reg_states

    # --- compose the whole (ordered) affine chain in the wrapper --------------
    order = np.asarray(inds, dtype=np.int64)
    s_seq = scales[order].astype(jnp.float32)            # (n_steps, C)
    b_seq = biases[order].astype(jnp.float32)            # (n_steps, C)
    if reverse:
        m_seq = jnp.exp(-s_seq)                          # y = (x - b) * exp(-s)
        a_seq = -b_seq * m_seq
        sign = 1.0
    else:
        m_seq = jnp.exp(s_seq)                           # y = x * exp(s) + b
        a_seq = b_seq
        sign = -1.0

    # y = x*M + A  with  M = prod_j m_j ,  A = sum_j a_j * prod_{k>j} m_k
    rev_cp = jnp.cumprod(m_seq[::-1], axis=0)[::-1]      # rev_cp[j] = prod_{k>=j} m_k
    M = rev_cp[0]                                        # (C,)
    suffix = jnp.concatenate([rev_cp[1:], jnp.ones((1, C), jnp.float32)], axis=0)
    A = jnp.sum(a_seq * suffix, axis=0)                  # (C,)

    # Data-independent log-det of the whole applied chain (hoisted out of kernel).
    # TODO(synk): data-dependent log-dets (CNF members) would need an in-kernel
    # per-tile reduction instead of this wrapper-side composition.
    logpx_out = (None if logpx_in is None
                 else logpx_in + sign * float(HW) * jnp.sum(s_seq))

    # --- lay (N, C) on sublanes, H*W on lanes ---------------------------------
    # bf16 inputs stay in bf16 on the VPU (v6e/v7x); otherwise compute in f32.
    compute_dtype = x.dtype if x.dtype == jnp.bfloat16 else jnp.float32
    rows, hw = N * C, HW
    x2 = x.reshape(rows, hw)
    itemsize = x2.dtype.itemsize
    m_rows = jnp.broadcast_to(M[None, :], (N, C)).reshape(rows, 1).astype(compute_dtype)
    a_rows = jnp.broadcast_to(A[None, :], (N, C)).reshape(rows, 1).astype(compute_dtype)

    # Sublane fold: if rows under-fill the vreg sublanes, fold a factor of H*W
    # onto the sublane axis so stores stay full (unmasked) vector stores.
    sublanes = 8 * (4 // itemsize) if itemsize in (1, 2, 4) else 8
    if rows % sublanes != 0:
        k = sublanes // math.gcd(rows, sublanes)
        if k > 1 and hw % k == 0:
            x2 = x2.reshape(rows * k, hw // k)
            m_rows = jnp.repeat(m_rows, k, axis=0)
            a_rows = jnp.repeat(a_rows, k, axis=0)
            rows, hw = rows * k, hw // k

    vmem_cap = _vmem_capacity_bytes()
    if tile_hw is None:
        tile_hw = _choose_tile_hw(hw, rows, itemsize, vmem_cap)
    elif tile_hw != hw and tile_hw % 128 != 0:
        raise ValueError(f"tile_hw={tile_hw} must be a multiple of 128 or equal H*W={hw}")
    n_tiles = pl.cdiv(hw, tile_hw)   # last tile is masked if hw % tile_hw != 0

    param_itemsize = jnp.dtype(compute_dtype).itemsize
    block_bytes = rows * tile_hw * itemsize
    param_block = ((rows + 7) // 8 * 8) * 128 * param_itemsize   # lane-padded in VMEM
    need = 4 * block_bytes + 4 * param_block + (2 << 20)         # double-buffered in+out
    vmem_limit = int(min(max(need, 8 << 20), max(16 << 20, vmem_cap * 3 // 4)))

    y2 = pl.pallas_call(
        _fused_affine_kernel,
        out_shape=jax.ShapeDtypeStruct((rows, hw), x.dtype),
        grid_spec=pltpu.PrefetchScalarGridSpec(
            num_scalar_prefetch=0,
            grid=(n_tiles,),
            in_specs=[
                # x: one lane-dense tile per grid step.
                pl.BlockSpec((rows, tile_hw), lambda t: (0, t)),
                # composed per-row params: tiny constant-index blocks, fetched once.
                pl.BlockSpec((rows, 1), lambda t: (0, 0)),
                pl.BlockSpec((rows, 1), lambda t: (0, 0)),
            ],
            out_specs=pl.BlockSpec((rows, tile_hw), lambda t: (0, t)),
        ),
        compiler_params=pltpu.CompilerParams(
            dimension_semantics=("parallel",),
            vmem_limit_bytes=vmem_limit,
        ),
        cost_estimate=pl.CostEstimate(
            flops=2 * rows * hw,
            transcendentals=0,
            bytes_accessed=2 * rows * hw * itemsize + 2 * rows * param_itemsize,
        ),
        input_output_aliases=({0: 0} if donate_x else {}),
    )(x2, m_rows, a_rows)

    return y2.reshape(N, C, H, W), logpx_out, reg_states


def _reference(x, logpx, scales, biases, reverse=False, inds=None):
    """Pure-JAX layer-by-layer reference of the same chain semantics."""
    N, C, H, W = x.shape
    L = scales.shape[0]
    if inds is None:
        inds = list(range(L - 1, -1, -1)) if reverse else list(range(L))
    lp = jnp.zeros((N, 1), jnp.float32) if logpx is None else logpx
    y = x
    for i in inds:
        s = scales[i].reshape(1, C, 1, 1)
        b = biases[i].reshape(1, C, 1, 1)
        ld = jnp.sum(scales[i]) * (H * W)
        if reverse:
            y = (y - b) * jnp.exp(-s)
            lp = lp + ld
        else:
            y = y * jnp.exp(s) + b
            lp = lp - ld
    return y, lp


if __name__ == "__main__":
    key = jax.random.PRNGKey(0)
    k1, k2, k3, k4 = jax.random.split(key, 4)

    N, C, H, W = 2, 4, 16, 16
    L = 3  # number of layers in the chain

    x = jax.random.normal(k1, (N, C, H, W), jnp.float32)
    logpx = jax.random.normal(k2, (N, 1), jnp.float32)
    scales = 0.1 * jax.random.normal(k3, (L, C), jnp.float32)
    biases = 0.05 * jax.random.normal(k4, (L, C), jnp.float32)

    # Forward pass (tile_hw=128 -> 2 spatial tiles, exercises the parallel axis).
    y, logpy, reg = sequential_flow(x, logpx, scales, biases,
                                    reg_states=(), reverse=False, tile_hw=128)
    jax.block_until_ready((y, logpy))
    y_ref, lp_ref = _reference(x, logpx, scales, biases, reverse=False)
    assert np.allclose(np.asarray(y), np.asarray(y_ref), atol=1e-5, rtol=1e-5)
    assert np.allclose(np.asarray(logpy), np.asarray(lp_ref), atol=1e-4, rtol=1e-5)

    # Reverse pass should invert the forward pass (layer order reversed).
    x_back, logpx_back, _ = sequential_flow(y, logpy, scales, biases,
                                            reg_states=(), reverse=True, tile_hw=128)
    jax.block_until_ready((x_back, logpx_back))
    assert np.allclose(np.asarray(x_back), np.asarray(x), atol=1e-4, rtol=1e-4)
    assert np.allclose(np.asarray(logpx_back), np.asarray(logpx),
                       atol=1e-4, rtol=1e-4)

    # Arbitrary `inds` order, auto (generation-aware) tile size.
    y_i, lp_i, _ = sequential_flow(x, logpx, scales, biases,
                                   reg_states=(), reverse=False, inds=[2, 0])
    jax.block_until_ready((y_i, lp_i))
    yi_ref, lpi_ref = _reference(x, logpx, scales, biases, reverse=False, inds=[2, 0])
    assert np.allclose(np.asarray(y_i), np.asarray(yi_ref), atol=1e-5, rtol=1e-5)
    assert np.allclose(np.asarray(lp_i), np.asarray(lpi_ref), atol=1e-4, rtol=1e-5)

    # logpx=None is passed through as None (container semantics), x still transformed.
    y_n, lp_n, _ = sequential_flow(x, None, scales, biases, reg_states=(), reverse=False)
    jax.block_until_ready(y_n)
    assert lp_n is None
    assert np.allclose(np.asarray(y_n), np.asarray(y_ref), atol=1e-5, rtol=1e-5)

    assert reg == ()
    print("KERNEL_OK")
</pallas_src>

<mosaic_0001>
module attributes {stable_mosaic.version = 11 : i64} {
  func.func @_fused_affine_kernel(%arg0: i32, %arg1: memref<8x128xf32, #tpu.memory_space<vmem>>, %arg2: memref<8x1xf32, #tpu.memory_space<vmem>>, %arg3: memref<8x1xf32, #tpu.memory_space<vmem>>, %arg4: memref<8x128xf32, #tpu.memory_space<vmem>>) attributes {dimension_semantics = [#tpu.dimension_semantics<parallel>], iteration_bounds = array<i64: 2>, scalar_prefetch = 0 : i64, scratch_operands = 0 : i64, tpu.core_type = #tpu.core_type<tc>, window_params = [{transform_indices = @transform_0, window_bounds = array<i64: 8, 128>}, {pipeline_mode = #tpu.pipeline_mode<synchronous>, transform_indices = @transform_1, window_bounds = array<i64: 8, 1>}, {pipeline_mode = #tpu.pipeline_mode<synchronous>, transform_indices = @transform_2, window_bounds = array<i64: 8, 1>}, {transform_indices = @transform_3, window_bounds = array<i64: 8, 128>}]} {
    %c0 = arith.constant 0 : index
    %c0_0 = arith.constant 0 : index
    %0 = vector.load %arg2[%c0, %c0_0] : memref<8x1xf32, #tpu.memory_space<vmem>>, vector<8x1xf32>
    %c0_1 = arith.constant 0 : index
    %c0_2 = arith.constant 0 : index
    %1 = vector.load %arg3[%c0_1, %c0_2] : memref<8x1xf32, #tpu.memory_space<vmem>>, vector<8x1xf32>
    %c0_3 = arith.constant 0 : index
    %c0_4 = arith.constant 0 : index
    %2 = vector.load %arg1[%c0_3, %c0_4] : memref<8x128xf32, #tpu.memory_space<vmem>>, vector<8x128xf32>
    %3 = vector.broadcast %0 : vector<8x1xf32> to vector<8x128xf32>
    %4 = arith.mulf %2, %3 : vector<8x128xf32>
    %5 = vector.broadcast %1 : vector<8x1xf32> to vector<8x128xf32>
    %6 = arith.addf %4, %5 : vector<8x128xf32>
    %c0_5 = arith.constant 0 : index
    %c0_6 = arith.constant 0 : index
    %7 = vector.load %arg4[%c0_5, %c0_6] : memref<8x128xf32, #tpu.memory_space<vmem>>, vector<8x128xf32>
    tpu.vector_store %arg4[%c0_5, %c0_6], %6 {strides = array<i32>} : memref<8x128xf32, #tpu.memory_space<vmem>>, vector<8x128xf32>,
    return
  }
  func.func @transform_0(%arg0: i32) -> (i32, i32) {
    %c0_i32 = arith.constant 0 : i32
    %c0_i32_0 = arith.constant 0 : i32
    return %c0_i32, %arg0 : i32, i32
  }
  func.func @transform_1(%arg0: i32) -> (i32, i32) {
    %c0_i32 = arith.constant 0 : i32
    %c0_i32_0 = arith.constant 0 : i32
    %c0_i32_1 = arith.constant 0 : i32
    return %c0_i32, %c0_i32_0 : i32, i32
  }
  func.func @transform_2(%arg0: i32) -> (i32, i32) {
    %c0_i32 = arith.constant 0 : i32
    %c0_i32_0 = arith.constant 0 : i32
    %c0_i32_1 = arith.constant 0 : i32
    return %c0_i32, %c0_i32_0 : i32, i32
  }
  func.func @transform_3(%arg0: i32) -> (i32, i32) {
    %c0_i32 = arith.constant 0 : i32
    %c0_i32_0 = arith.constant 0 : i32
    return %c0_i32, %arg0 : i32, i32
  }
}

</mosaic_0001>

<bundles_post_ra>
// kernel: tpu_custom_call.1
= control target key start
LH: loop header
LB: loop body
LE: loop exit
PB: predicated region body
PF: predicated region fallthrough
CT: control target
= control target key end

     0   :  { %8 = vsyncpa [#allocation3], 0  ;;  %s498_s0 = inlined_call_operand.vmem [shape: f32[8,256], index: 0, kind: input, shape index: {}]   ;;  %s499_s1 = inlined_call_operand.vmem [shape: f32[8,1], index: 1, kind: input, shape index: {}]   ;;  %s500_s2 = inlined_call_operand.vmem [shape: f32[8,1], index: 2, kind: input, shape index: {}]   ;;  %s501_s3 = inlined_call_operand.hbm [shape: f32[8,256], index: 3, kind: output, shape index: {}]  }
   0x1   :  { %10 = vsyncpa [#allocation3 + $0x1], 0  ;;  %s392_s12 = smov 0   ;;  %s394_s13 = smov 0  }
   0x2   :  { %s396_s14 = smov 0   ;;  %s398_s15 = smov 0  }
   0x3 LB: > { %s413_s16 = sadd.s32 4294967295, %s368_s15   ;;  %s255_s17 = sadd.s32 4294967294, %s368_s15   ;;  %s368_s15 = sphi %s398_s15, %s507_s15   ;;  %s364_s14 = sphi %s396_s14, %s506_s14   ;;  %s360_s13 = sphi %s394_s13, %s505_s13   ;;  %s356_s12 = sphi %s392_s12, %s504_s12  }
   0x4   : > { %s417_s18 = sadd.s32 1, %s368_s15   ;;  %s91_s19 = sadd.s32 1, %s364_s14 }
   0x5   : > { %s88_s20 = ssub.s32 %s368_s15, %s417_s18  ;;  %p101_p0 = scmp.ne.s32.totalorder %s364_s14, %s360_s13 }
   0x6   : > { %p89_p1 = scmp.eq.s32.totalorder %s88_s20, 0  ;;  %p102_p2 = scmp.eq.s32.totalorder %s413_s16, 1 }
   0x7   : > { %p107_p3 = scmp.ne.s32.totalorder %s360_s13, %s356_s12  ;;  %p108_p4 = scmp.eq.s32.totalorder %s255_s17, 1 }
   0x8   : > { %s428_s21 = scalar_select %p89_p1, %s364_s14, %s91_s19  }
   0x9   : > { %p430_p5 = por %p102_p2, %p101_p0  ;;  %p434_p6 = por %p108_p4, %p107_p3 }
   0xa   : > { %p258_p7 = scmp.ge.s32.totalorder %s368_s15, 1  ;;  %p139_p8 = scmp.lt.s32.totalorder %s368_s15, 3 }
   0xc   : > { %p140_p9 = pnand %p258_p7, %p139_p8 }
   0xd   : > { %v166_v0 = vld [vmem:[%s499_s1] sm:$0xff] (!%p140_p9)  ;;  %v370_v1 = vmov (!%p140_p9), 0   ;;  %p162_p10 = scmp.lt.s32.totalorder (!%p140_p9), %s413_s16, 1  ;;  %s159_s29 = sand.u32 (!%p140_p9), 1, %s360_s13  }
   0xe   : > { %143 = sbr.rel (%p140_p9) target bundleno = 163 (0xa3), region = 32  ;;  %305 = vset.pattern.permute.xlu0 (!%p140_p9), %v370_v1  ;;  %v167_v2 = vld [vmem:[%s500_s2] sm:$0xff] (!%p140_p9)  ;;  %s259_s4 = sshll.u32 (!%p140_p9), %s159_s29, 3 }
   0xf   : > { %171 = vperm.xlu0 (!%p140_p9), %305, %v166_v0   ;;  %s262_s8 = sshll.u32 (!%p140_p9), %s413_s16, 7  ;;  %s161_s9 = scalar_lea.vmem (!%p140_p9), [#allocation2], %s259_s4 }
  0x10   : > { %s196_s10 = sshll.u32 (!%p140_p9), %s161_s9, 4  ;;  %s456_s19 = scalar_lea.hbm (!%p140_p9), %s501_s3, %s262_s8  ;;  %s458_s10 = int_to_ptr.vmem [resolvable:$true] %s196_s10 }
  0x11   : > { %s183_s20 = scalar_lea.sflag (!%p140_p9), [#allocation3], %s159_s29  ;;  %s306_s24 = scalar_lea.vmem (!%p140_p9), %s458_s10, 128 }
  0x12   : > { %p307_p11 = scmp.ne.s32.totalorder (!%p140_p9), %s458_s10, %s306_s24 }
  0x13   : > { %177 = vperm.xlu0 (!%p140_p9), %305, %v167_v2  }
  0x14   : > { %p308_p12 = pnand (!%p140_p9), %p307_p11, %p430_p5 }
  0x15   : > { %s163_s28 = scalar_select %p162_p10, %s413_s16, 1 }
  0x16   : > { %p309_p13 = pneg %p308_p12  ;;  %s371_s16 = smov [#allocation2]  }
  0x17   : > { %s260_s30 = sshll.u32 %s163_s28, 3  ;;  %s310_s25 = sshll.u32 %s371_s16, 4  ;;  %s311_s25 = int_to_ptr.vmem [resolvable:$false] %s310_s25 }
  0x18   : > { %s165_s7 = scalar_lea.vmem %s498_s0, %s260_s30  ;;  %s312_s26 = scalar_lea.vmem %s311_s25, 256 }
  0x19   : > { %v168_v4 = vld [vmem:[%s165_s7] sm:$0xff]  ;;  %p313_p0 = scmp.lt.s32.totalorder %s458_s10, %s311_s25  ;;  %p314_p1 = scmp.lt.s32.totalorder %s312_s26, %s306_s24 }
  0x1b   : > { %p315_p2 = por %p314_p1, %p313_p0 }
  0x1d   : > { %p316_p3 = pnand %p315_p2, %p309_p13 }
  0x8e   : > { %v172_v3 = vpop.permute.xlu0 %171 }
  0x8f   : > { %v174_v5 = vmul.f32 %v172_v3, %v168_v4 }
  0x92   : > { %v178_v6 = vpop.permute.xlu0 %177 }
  0x93   : > { %v180_v7 = vadd.f32 %v178_v6, %v174_v5 }
  0x95   : > { %181 = vst [vmem:[%s161_s9] sm:$0xff] %v180_v7 }
  0x96   : > { %319 = shalt.err (!%p316_p3)
}
  0x97   : > { %s320_s27 = scalar_lea.hbm %s456_s19, 128  ;;  %s324_s30 = scalar_lea.hbm %s501_s3, 256 }
  0x98   : > { %p321_p4 = scmp.ne.s32.totalorder %s456_s19, %s320_s27  ;;  %p325_p9 = scmp.lt.u32.totalorder %s456_s19, %s501_s3 }
  0x99   : > { %p326_p10 = scmp.lt.u32.totalorder %s324_s30, %s320_s27  ;;  %p328_p12 = scmp.lt.u32.totalorder %s320_s27, %s456_s19 }
  0x9a   : > { %p322_p7 = pnand %p321_p4, %p430_p5 }
  0x9b   : > { %p327_p11 = por %p326_p10, %p325_p9 }
  0x9c   : > { %p323_p8 = pneg %p322_p7 }
  0x9d   : > { %p329_p13 = por %p328_p12, %p327_p11 }
  0x9f   : > { %p330_p0 = pnand %p329_p13, %p323_p8 }
  0xa1   : > { %333 = shalt.err (!%p330_p0)
}
  0xa2   : > { %265 = dma.vmem_to_hbm [thread:$0]  (%p430_p5), %s458_s10, 128, %s456_s19, %s183_s20  }
  0xa3 PF: > { %p271_p1 = scmp.ge.s32.totalorder %s368_s15, 2  ;;  %s208_s6 = sand.u32 1, %s356_s12  }
  0xa4   : > { %s209_s7 = scalar_lea.sflag [#allocation3], %s208_s6 }
  0xa5   : > { %p268_p2 = pnand %p271_p1, %p434_p6 }
  0xa7   : > { %351 = dma.done.wait (!%p268_p2), %s209_s7, 128  }
  0xa8   : > { %353 = vsyncadd (!%p268_p2), %s209_s7, 4294967168  ;;  %p13_p3 = scmp.ge.s32.totalorder %s417_s18, 4   ;;  %s504_s12 = smov %s360_s13 }
  0xa9   : > { %s505_s13 = smov %s364_s14  ;;  %s506_s14 = smov %s428_s21 }
  0xaa   : > { %s507_s15 = smov %s417_s18  ;;  %15 = sbr.rel (!%p13_p3) target bundleno = 3 (0x3), region = 67 }
  0xb1   :  { %214 = vsyncpa [#allocation3], 1 }
  0xb2   :  { %216 = vsyncpa [#allocation3 + $0x1], 1 }

</bundles_post_ra>
